<compile_context>
chip_gen: v7x
topology: tpu7x:2x2x1
jax: 0.10.0
libtpu: 0.0.40
codegen_flags: <defaults>
</compile_context>

<pallas_src>
import jax
import jax.numpy as jnp
from jax import lax
from jax.experimental import pallas as pl
from jax.experimental.pallas import tpu as pltpu


# (row_offset, col_offset) of each neighbour relative to the centre pixel and
# its LBP bit weight, in the exact order used by the PyTorch forward pass.
_NEIGHBORS = (
    ((-1, 0), 1),     # y01
    ((-1, 1), 2),     # y02
    ((0, 1), 4),      # y12
    ((1, 1), 8),      # y22
    ((1, 0), 16),     # y21
    ((1, -1), 32),    # y20
    ((0, -1), 64),    # y10
    ((-1, -1), 128),  # y00
)


def _make_lbp_kernel(H, W):
    HW = H * W

    def kernel(x_ref, out_ref):
        # x_ref:   (TB, HW)  pixels, one image per row (flat H*W, lane-dense)
        # out_ref: (TB, HW)  LBP codes
        x = x_ref[...]

        # Flat-position row/col indices, kept at (1, HW): tiny VALU work per
        # grid step; broadcast lazily inside the per-neighbour selects so no
        # TB x HW boolean masks stay live across the whole 8-tap loop.
        pos = lax.broadcasted_iota(jnp.int32, (1, HW), 1)
        row = lax.div(pos, W)           # W=16 -> lowers to a shift
        col = pos - row * W
        row_ok = {-1: row >= 1, 0: None, 1: row <= H - 2}
        col_ok = {-1: col >= 1, 0: None, 1: col <= W - 2}

        zero = jnp.zeros((), dtype=x.dtype)   # dtype-matched pad value
        val = jnp.zeros(x.shape, dtype=jnp.int32)
        for (dr, dc), weight in _NEIGHBORS:
            d = dr * W + dc
            # Neighbour tap as a static lane rotation (XLU slot). Positions
            # that wrap around the flat image correspond exactly to F.pad's
            # zero border and are forced to 0 by the boundary mask below.
            nb = pltpu.roll(x, shift=(-d) % HW, axis=1)
            rm, cm = row_ok[dr], col_ok[dc]
            if rm is None:
                mask = cm
            elif cm is None:
                mask = rm
            else:
                mask = jnp.logical_and(rm, cm)
            nb = jnp.where(mask, nb, zero)
            # bit * weight as a select: no bool cast, no integer multiply.
            val = val + jnp.where(nb >= x, jnp.int32(weight), jnp.int32(0))

        out_ref[...] = val.astype(out_ref.dtype)

    return kernel


def _choose_block_rows(B, HW, itemsize, target_bytes=4 << 20):
    """Images per grid step: large, sublane-aligned blocks (big DMAs).

    No minimum-step-count cap: on single-TC v5e/v6e extra grid steps are pure
    per-step overhead; on v7x the 'parallel' axis still shards what remains.
    """
    if B <= 8:
        return B                                   # full leading dim: always legal
    tb = max(8, target_bytes // (HW * itemsize))   # ~4 MiB of input per block
    tb = max(8, (tb // 8) * 8)                     # sublane (8) aligned
    return min(tb, B)


def lbp_layer(x, *, block_rows=None, out_dtype=jnp.int32):
    """x: (N, C, H, W) array. Returns (N, C, H, W) LBP codes in [0, 255].

    Pass out_dtype=jnp.uint8 to cut output HBM writeback 4x when 8-bit codes
    are acceptable downstream.
    """
    N, C, H, W = x.shape
    B, HW = N * C, H * W

    # Free reshape (merges contiguous dims): the lane axis becomes H*W
    # (lane-dense loads/stores; 256 lanes for 16x16 images).
    x2 = x.reshape(B, HW)

    tb = block_rows or _choose_block_rows(B, HW, x.dtype.itemsize)
    num_blocks = pl.cdiv(B, tb)
    b_padded = num_blocks * tb
    if b_padded != B:                 # only when N*C doesn't divide the block
        x2 = jnp.pad(x2, ((0, b_padded - B), (0, 0)))

    # VMEM limit from actual usage: double-buffered input + output tiles,
    # plus headroom. Stays well inside v7x's 64 MiB for the default tiling.
    out_itemsize = jnp.dtype(out_dtype).itemsize
    usage = 2 * tb * HW * (x.dtype.itemsize + out_itemsize)
    vmem_limit = int(min(max(usage + (8 << 20), 16 << 20), 56 << 20))

    # TODO(synk): very large images (H*W rows of several MiB, or H*W not a
    # lane multiple) would want an extra spatial tiling with a 1-row halo;
    # not required at these sizes.
    out = pl.pallas_call(
        _make_lbp_kernel(H, W),
        out_shape=jax.ShapeDtypeStruct((b_padded, HW), out_dtype),
        grid_spec=pltpu.PrefetchScalarGridSpec(
            num_scalar_prefetch=0,
            grid=(num_blocks,),
            in_specs=[pl.BlockSpec((tb, HW), lambda i: (i, 0))],
            out_specs=pl.BlockSpec((tb, HW), lambda i: (i, 0)),
        ),
        compiler_params=pltpu.CompilerParams(
            dimension_semantics=("parallel",),
            vmem_limit_bytes=vmem_limit,
        ),
    )(x2)

    return out[:B].reshape(N, C, H, W)


def _lbp_reference(x):
    """Pure-jnp reference mirroring the PyTorch slicing code."""
    H, W = x.shape[2], x.shape[3]
    xp = jnp.pad(x, ((0, 0), (0, 0), (1, 1), (1, 1)), mode="constant")
    center = xp[:, :, 1:1 + H, 1:1 + W]
    val = jnp.zeros(x.shape, dtype=jnp.int32)
    for (dr, dc), weight in _NEIGHBORS:
        nb = xp[:, :, 1 + dr:1 + dr + H, 1 + dc:1 + dc + W]
        val = val + (nb >= center).astype(jnp.int32) * weight
    return val


if __name__ == "__main__":
    key = jax.random.PRNGKey(0)
    x = jax.random.normal(key, (2, 4, 16, 16), dtype=jnp.float32)

    out = jax.jit(lbp_layer)(x)
    out = jax.block_until_ready(out)

    ref = _lbp_reference(x)
    assert out.shape == (2, 4, 16, 16)
    assert out.dtype == jnp.int32
    assert bool(jnp.all(out == ref))

    print("KERNEL_OK")
</pallas_src>

<mosaic_0001>
module attributes {stable_mosaic.version = 11 : i64} {
  func.func @kernel(%arg0: i32, %arg1: memref<8x256xf32, #tpu.memory_space<vmem>>, %arg2: memref<8x256xi32, #tpu.memory_space<vmem>>) attributes {dimension_semantics = [#tpu.dimension_semantics<parallel>], iteration_bounds = array<i64: 1>, scalar_prefetch = 0 : i64, scratch_operands = 0 : i64, tpu.core_type = #tpu.core_type<tc>, window_params = [{transform_indices = @transform_0, window_bounds = array<i64: 8, 256>}, {transform_indices = @transform_1, window_bounds = array<i64: 8, 256>}]} {
    %c0 = arith.constant 0 : index
    %c0_0 = arith.constant 0 : index
    %0 = vector.load %arg1[%c0, %c0_0] : memref<8x256xf32, #tpu.memory_space<vmem>>, vector<8x256xf32>
    %1 = tpu.iota {dimensions = array<i32: 1>} : vector<1x256xi32>
    %c16_i32 = arith.constant 16 : i32
    %2 = vector.broadcast %c16_i32 : i32 to vector<1x256xi32>
    %3 = arith.divsi %1, %2 : vector<1x256xi32>
    %c16_i32_1 = arith.constant 16 : i32
    %4 = vector.broadcast %c16_i32_1 : i32 to vector<1x256xi32>
    %5 = arith.muli %3, %4 : vector<1x256xi32>
    %6 = arith.subi %1, %5 : vector<1x256xi32>
    %c1_i32 = arith.constant 1 : i32
    %7 = vector.broadcast %c1_i32 : i32 to vector<1x256xi32>
    %8 = arith.cmpi sge, %3, %7 : vector<1x256xi32>
    %c14_i32 = arith.constant 14 : i32
    %9 = vector.broadcast %c14_i32 : i32 to vector<1x256xi32>
    %10 = arith.cmpi sle, %3, %9 : vector<1x256xi32>
    %c1_i32_2 = arith.constant 1 : i32
    %11 = vector.broadcast %c1_i32_2 : i32 to vector<1x256xi32>
    %12 = arith.cmpi sge, %6, %11 : vector<1x256xi32>
    %c14_i32_3 = arith.constant 14 : i32
    %13 = vector.broadcast %c14_i32_3 : i32 to vector<1x256xi32>
    %14 = arith.cmpi sle, %6, %13 : vector<1x256xi32>
    %c0_i32 = arith.constant 0 : i32
    %15 = vector.broadcast %c0_i32 : i32 to vector<8x256xi32>
    %c16_i32_4 = arith.constant 16 : i32
    %16 = tpu.dynamic_rotate %0 by %c16_i32_4 dim 1 : vector<8x256xf32>, i32 -> vector<8x256xf32>
    %cst = arith.constant 0.000000e+00 : f32
    %17 = vector.shape_cast %8 : vector<1x256xi1> to vector<1x256xi1>
    %18 = vector.broadcast %17 : vector<1x256xi1> to vector<8x256xi1>
    %19 = vector.broadcast %cst : f32 to vector<8x256xf32>
    %20 = arith.select %18, %16, %19 : vector<8x256xi1>, vector<8x256xf32>
    %21 = arith.cmpf oge, %20, %0 : vector<8x256xf32>
    %c1_i32_5 = arith.constant 1 : i32
    %c0_i32_6 = arith.constant 0 : i32
    %22 = vector.broadcast %c1_i32_5 : i32 to vector<8x256xi32>
    %23 = vector.broadcast %c0_i32_6 : i32 to vector<8x256xi32>
    %24 = arith.select %21, %22, %23 : vector<8x256xi1>, vector<8x256xi32>
    %25 = arith.addi %15, %24 : vector<8x256xi32>
    %c15_i32 = arith.constant 15 : i32
    %26 = tpu.dynamic_rotate %0 by %c15_i32 dim 1 : vector<8x256xf32>, i32 -> vector<8x256xf32>
    %27 = arith.andi %8, %14 : vector<1x256xi1>
    %cst_7 = arith.constant 0.000000e+00 : f32
    %28 = vector.shape_cast %27 : vector<1x256xi1> to vector<1x256xi1>
    %29 = vector.broadcast %28 : vector<1x256xi1> to vector<8x256xi1>
    %30 = vector.broadcast %cst_7 : f32 to vector<8x256xf32>
    %31 = arith.select %29, %26, %30 : vector<8x256xi1>, vector<8x256xf32>
    %32 = arith.cmpf oge, %31, %0 : vector<8x256xf32>
    %c2_i32 = arith.constant 2 : i32
    %c0_i32_8 = arith.constant 0 : i32
    %33 = vector.broadcast %c2_i32 : i32 to vector<8x256xi32>
    %34 = vector.broadcast %c0_i32_8 : i32 to vector<8x256xi32>
    %35 = arith.select %32, %33, %34 : vector<8x256xi1>, vector<8x256xi32>
    %36 = arith.addi %25, %35 : vector<8x256xi32>
    %c255_i32 = arith.constant 255 : i32
    %37 = tpu.dynamic_rotate %0 by %c255_i32 dim 1 : vector<8x256xf32>, i32 -> vector<8x256xf32>
    %cst_9 = arith.constant 0.000000e+00 : f32
    %38 = vector.shape_cast %14 : vector<1x256xi1> to vector<1x256xi1>
    %39 = vector.broadcast %38 : vector<1x256xi1> to vector<8x256xi1>
    %40 = vector.broadcast %cst_9 : f32 to vector<8x256xf32>
    %41 = arith.select %39, %37, %40 : vector<8x256xi1>, vector<8x256xf32>
    %42 = arith.cmpf oge, %41, %0 : vector<8x256xf32>
    %c4_i32 = arith.constant 4 : i32
    %c0_i32_10 = arith.constant 0 : i32
    %43 = vector.broadcast %c4_i32 : i32 to vector<8x256xi32>
    %44 = vector.broadcast %c0_i32_10 : i32 to vector<8x256xi32>
    %45 = arith.select %42, %43, %44 : vector<8x256xi1>, vector<8x256xi32>
    %46 = arith.addi %36, %45 : vector<8x256xi32>
    %c239_i32 = arith.constant 239 : i32
    %47 = tpu.dynamic_rotate %0 by %c239_i32 dim 1 : vector<8x256xf32>, i32 -> vector<8x256xf32>
    %48 = arith.andi %10, %14 : vector<1x256xi1>
    %cst_11 = arith.constant 0.000000e+00 : f32
    %49 = vector.shape_cast %48 : vector<1x256xi1> to vector<1x256xi1>
    %50 = vector.broadcast %49 : vector<1x256xi1> to vector<8x256xi1>
    %51 = vector.broadcast %cst_11 : f32 to vector<8x256xf32>
    %52 = arith.select %50, %47, %51 : vector<8x256xi1>, vector<8x256xf32>
    %53 = arith.cmpf oge, %52, %0 : vector<8x256xf32>
    %c8_i32 = arith.constant 8 : i32
    %c0_i32_12 = arith.constant 0 : i32
    %54 = vector.broadcast %c8_i32 : i32 to vector<8x256xi32>
    %55 = vector.broadcast %c0_i32_12 : i32 to vector<8x256xi32>
    %56 = arith.select %53, %54, %55 : vector<8x256xi1>, vector<8x256xi32>
    %57 = arith.addi %46, %56 : vector<8x256xi32>
    %c240_i32 = arith.constant 240 : i32
    %58 = tpu.dynamic_rotate %0 by %c240_i32 dim 1 : vector<8x256xf32>, i32 -> vector<8x256xf32>
    %cst_13 = arith.constant 0.000000e+00 : f32
    %59 = vector.shape_cast %10 : vector<1x256xi1> to vector<1x256xi1>
    %60 = vector.broadcast %59 : vector<1x256xi1> to vector<8x256xi1>
    %61 = vector.broadcast %cst_13 : f32 to vector<8x256xf32>
    %62 = arith.select %60, %58, %61 : vector<8x256xi1>, vector<8x256xf32>
    %63 = arith.cmpf oge, %62, %0 : vector<8x256xf32>
    %c16_i32_14 = arith.constant 16 : i32
    %c0_i32_15 = arith.constant 0 : i32
    %64 = vector.broadcast %c16_i32_14 : i32 to vector<8x256xi32>
    %65 = vector.broadcast %c0_i32_15 : i32 to vector<8x256xi32>
    %66 = arith.select %63, %64, %65 : vector<8x256xi1>, vector<8x256xi32>
    %67 = arith.addi %57, %66 : vector<8x256xi32>
    %c241_i32 = arith.constant 241 : i32
    %68 = tpu.dynamic_rotate %0 by %c241_i32 dim 1 : vector<8x256xf32>, i32 -> vector<8x256xf32>
    %69 = arith.andi %10, %12 : vector<1x256xi1>
    %cst_16 = arith.constant 0.000000e+00 : f32
    %70 = vector.shape_cast %69 : vector<1x256xi1> to vector<1x256xi1>
    %71 = vector.broadcast %70 : vector<1x256xi1> to vector<8x256xi1>
    %72 = vector.broadcast %cst_16 : f32 to vector<8x256xf32>
    %73 = arith.select %71, %68, %72 : vector<8x256xi1>, vector<8x256xf32>
    %74 = arith.cmpf oge, %73, %0 : vector<8x256xf32>
    %c32_i32 = arith.constant 32 : i32
    %c0_i32_17 = arith.constant 0 : i32
    %75 = vector.broadcast %c32_i32 : i32 to vector<8x256xi32>
    %76 = vector.broadcast %c0_i32_17 : i32 to vector<8x256xi32>
    %77 = arith.select %74, %75, %76 : vector<8x256xi1>, vector<8x256xi32>
    %78 = arith.addi %67, %77 : vector<8x256xi32>
    %c1_i32_18 = arith.constant 1 : i32
    %79 = tpu.dynamic_rotate %0 by %c1_i32_18 dim 1 : vector<8x256xf32>, i32 -> vector<8x256xf32>
    %cst_19 = arith.constant 0.000000e+00 : f32
    %80 = vector.shape_cast %12 : vector<1x256xi1> to vector<1x256xi1>
    %81 = vector.broadcast %80 : vector<1x256xi1> to vector<8x256xi1>
    %82 = vector.broadcast %cst_19 : f32 to vector<8x256xf32>
    %83 = arith.select %81, %79, %82 : vector<8x256xi1>, vector<8x256xf32>
    %84 = arith.cmpf oge, %83, %0 : vector<8x256xf32>
    %c64_i32 = arith.constant 64 : i32
    %c0_i32_20 = arith.constant 0 : i32
    %85 = vector.broadcast %c64_i32 : i32 to vector<8x256xi32>
    %86 = vector.broadcast %c0_i32_20 : i32 to vector<8x256xi32>
    %87 = arith.select %84, %85, %86 : vector<8x256xi1>, vector<8x256xi32>
    %88 = arith.addi %78, %87 : vector<8x256xi32>
    %c17_i32 = arith.constant 17 : i32
    %89 = tpu.dynamic_rotate %0 by %c17_i32 dim 1 : vector<8x256xf32>, i32 -> vector<8x256xf32>
    %90 = arith.andi %8, %12 : vector<1x256xi1>
    %cst_21 = arith.constant 0.000000e+00 : f32
    %91 = vector.shape_cast %90 : vector<1x256xi1> to vector<1x256xi1>
    %92 = vector.broadcast %91 : vector<1x256xi1> to vector<8x256xi1>
    %93 = vector.broadcast %cst_21 : f32 to vector<8x256xf32>
    %94 = arith.select %92, %89, %93 : vector<8x256xi1>, vector<8x256xf32>
    %95 = arith.cmpf oge, %94, %0 : vector<8x256xf32>
    %c128_i32 = arith.constant 128 : i32
    %c0_i32_22 = arith.constant 0 : i32
    %96 = vector.broadcast %c128_i32 : i32 to vector<8x256xi32>
    %97 = vector.broadcast %c0_i32_22 : i32 to vector<8x256xi32>
    %98 = arith.select %95, %96, %97 : vector<8x256xi1>, vector<8x256xi32>
    %99 = arith.addi %88, %98 : vector<8x256xi32>
    %c0_23 = arith.constant 0 : index
    %c0_24 = arith.constant 0 : index
    %100 = vector.load %arg2[%c0_23, %c0_24] : memref<8x256xi32, #tpu.memory_space<vmem>>, vector<8x256xi32>
    tpu.vector_store %arg2[%c0_23, %c0_24], %99 {strides = array<i32>} : memref<8x256xi32, #tpu.memory_space<vmem>>, vector<8x256xi32>,
    return
  }
  func.func @transform_0(%arg0: i32) -> (i32, i32) {
    %c0_i32 = arith.constant 0 : i32
    %c0_i32_0 = arith.constant 0 : i32
    return %arg0, %c0_i32 : i32, i32
  }
  func.func @transform_1(%arg0: i32) -> (i32, i32) {
    %c0_i32 = arith.constant 0 : i32
    %c0_i32_0 = arith.constant 0 : i32
    return %arg0, %c0_i32 : i32, i32
  }
}

</mosaic_0001>

<bundles_post_ra>
// kernel: lbp_layer.1
= control target key start
LH: loop header
LB: loop body
LE: loop exit
PB: predicated region body
PF: predicated region fallthrough
CT: control target
= control target key end

     0   :  { %s212_s8 = smov 15   ;;  %s213_s9 = smov 16   ;;  %v10_v2 = vlaneseq  ;;  %v220_v37 = vmov 0   ;;  %s382_s0 = inlined_call_operand.vmem [shape: f32[8,256], index: 0, kind: input, shape index: {}]   ;;  %s383_s1 = inlined_call_operand.vmem [shape: s32[8,256], index: 1, kind: output, shape index: {}]  }
   0x1   :  { %v234_v0 = vld [vmem:[%s382_s0] sm:$0xff]  ;;  %v241_v1 = vld [vmem:[%s382_s0 + $0x8] sm:$0xff]  ;;  %s214_s12 = smov 127   ;;  %s215_s13 = smov 111  }
   0x2   :  { %56 = vrot.lane.b32.xlu1 %v234_v0, %s212_s8  ;;  %39 = vrot.lane.b32.xlu0 %v234_v0, %s213_s9  ;;  %s216_s14 = smov 112   ;;  %s217_s0 = smov 113   ;;  %v257_v3 = vand.u32 127, %v10_v2 }
   0x3   :  { %s218_s15 = smov 1   ;;  %s219_s16 = smov 17  }
   0x4   :  { %v12_v4 = vadd.s32 128, %v257_v3  ;;  %v16_v5 = vshrl.u32 %v257_v3, 4  ;;  %vm60_vm0 = vcmp.lt.s32.totalorder %v257_v3, 15  ;;  %vm43_vm3 = vcmp.lt.s32.totalorder %v257_v3, 16 }
   0x5   :  { %vm81_vm5 = vcmp.lt.s32.totalorder %v257_v3, 127  ;;  %vm100_vm8 = vcmp.lt.s32.totalorder %v257_v3, 111  ;;  %vm121_vm15 = vcmp.lt.s32.totalorder %v257_v3, 112 }
   0x6   :  { %58 = vrot.lane.b32.xlu1 %v241_v1, %s212_s8  ;;  %41 = vrot.lane.b32.xlu0 %v241_v1, %s213_s9  ;;  %v23_v6 = vshrl.u32 %v12_v4, 4  ;;  %v27_v7 = vmul.u32 16, %v16_v5  ;;  %vm267_vm1 = vcmp.ge.s32.totalorder %v16_v5, 1 }
   0x8   :  { %v28_v8 = vmul.u32 16, %v23_v6  ;;  %v262_v9 = vsub.s32 %v257_v3, %v27_v7  ;;  %vm289_vm7 = vcmp.le.s32.totalorder %v23_v6, 14 }
   0xa   :  { %79 = vrot.lane.b32.xlu1 %v241_v1, %s214_s12  ;;  %77 = vrot.lane.b32.xlu0 %v234_v0, %s214_s12  ;;  %v265_v12 = vsub.s32 %v12_v4, %v28_v8  ;;  %vm37_vm2 = vcmp.le.s32.totalorder %v262_v9, 14 }
   0xb   :  { %vm277_vm4 = vmand %vm267_vm1, %vm37_vm2 }
   0xc   :  { %vm38_vm6 = vcmp.le.s32.totalorder %v265_v12, 14 }
   0xd   :  { %vm304_vm13 = vmand %vm289_vm7, %vm38_vm6 }
   0xe   :  { %98 = vrot.lane.b32.xlu1 %v241_v1, %s215_s13  ;;  %96 = vrot.lane.b32.xlu0 %v234_v0, %s215_s13 }
  0x12   :  { %119 = vrot.lane.b32.xlu1 %v241_v1, %s216_s14  ;;  %117 = vrot.lane.b32.xlu0 %v234_v0, %s216_s14 }
  0x16   :  { %138 = vrot.lane.b32.xlu1 %v241_v1, %s217_s0  ;;  %136 = vrot.lane.b32.xlu0 %v234_v0, %s217_s0 }
  0x1a   :  { %159 = vrot.lane.b32.xlu1 %v241_v1, %s218_s15  ;;  %157 = vrot.lane.b32.xlu0 %v234_v0, %s218_s15 }
  0x1e   :  { %178 = vrot.lane.b32.xlu1 %v241_v1, %s219_s16  ;;  %176 = vrot.lane.b32.xlu0 %v234_v0, %s219_s16 }
  0x74   :  { %v57_v10 = vpop.permute.xlu1 %56  ;;  %v40_v11 = vpop.permute.xlu0 %39 }
  0x78   :  { %v59_v14 = vpop.permute.xlu1 %58  ;;  %v42_v15 = vpop.permute.xlu0 %41 }
  0x79   :  { %v62_v17 = vsel %vm60_vm0, %v59_v14, %v57_v10  ;;  %v45_v18 = vsel %vm43_vm3, %v42_v15, %v40_v11  ;;  %v61_v19 = vsel %vm60_vm0, %v57_v10, %v59_v14  ;;  %v44_v26 = vsel %vm43_vm3, %v40_v11, %v42_v15 }
  0x7a   :  { %v69_v22 = vsel %vm277_vm4, %v62_v17, 0.0  ;;  %v50_v23 = vsel %vm267_vm1, %v45_v18, 0.0  ;;  %v70_v25 = vsel %vm38_vm6, %v61_v19, 0.0  ;;  %vm53_vm12 = vcmp.ge.f32.partialorder %v44_v26, %v241_v1 }
  0x7b   :  { %vm71_vm9 = vcmp.ge.f32.partialorder %v69_v22, %v234_v0  ;;  %vm52_vm10 = vcmp.ge.f32.partialorder %v50_v23, %v234_v0  ;;  %vm72_vm11 = vcmp.ge.f32.partialorder %v70_v25, %v241_v1  ;;  %v55_v41 = vsel %vm53_vm12, 1, %v220_v37 }
  0x7c   :  { %v80_v20 = vpop.permute.xlu1 %79  ;;  %v78_v21 = vpop.permute.xlu0 %77  ;;  %v73_v38 = vsel %vm71_vm9, 2, %v220_v37  ;;  %v54_v39 = vsel %vm52_vm10, 1, %v220_v37  ;;  %v74_v40 = vsel %vm72_vm11, 2, %v220_v37  ;;  %vm36_vm0 = vcmp.ge.s32.totalorder %v265_v12, 1 }
  0x7d   :  { %v82_v24 = vsel %vm81_vm5, %v78_v21, %v80_v20  ;;  %v83_v28 = vsel %vm81_vm5, %v80_v20, %v78_v21  ;;  %v75_v47 = vadd.s32 %v73_v38, %v54_v39  ;;  %vm140_vm4 = vcmp.lt.s32.totalorder %v257_v3, 113 }
  0x7e   :  { %v88_v29 = vsel %vm37_vm2, %v82_v24, 0.0  ;;  %v89_v35 = vsel %vm38_vm6, %v83_v28, 0.0  ;;  %vm35_vm6 = vcmp.ge.s32.totalorder %v262_v9, 1  ;;  %v76_v51 = vadd.s32 %v74_v40, %v55_v41 }
  0x7f   :  { %vm90_vm14 = vcmp.ge.f32.partialorder %v88_v29, %v234_v0 }
  0x80   :  { %v99_v30 = vpop.permute.xlu1 %98  ;;  %v97_v31 = vpop.permute.xlu0 %96  ;;  %v92_v45 = vsel %vm90_vm14, 4, %v220_v37 }
  0x81   :  { %v101_v33 = vsel %vm100_vm8, %v97_v31, %v99_v30  ;;  %v102_v34 = vsel %vm100_vm8, %v99_v30, %v97_v31  ;;  %vm333_vm8 = vmand %vm289_vm7, %vm36_vm0  ;;  %v94_v53 = vadd.s32 %v92_v45, %v75_v47 }
  0x82   :  { %v109_v36 = vsel %vm37_vm2, %v101_v33, 0.0  ;;  %v110_v42 = vsel %vm304_vm13, %v102_v34, 0.0  ;;  %vm91_vm2 = vcmp.ge.f32.partialorder %v89_v35, %v241_v1  ;;  %vm180_vm13 = vcmp.lt.s32.totalorder %v257_v3, 17 }
  0x83   :  { %vm111_vm3 = vcmp.ge.f32.partialorder %v109_v36, %v234_v0  ;;  %vm112_vm5 = vcmp.ge.f32.partialorder %v110_v42, %v241_v1  ;;  %v93_v52 = vsel %vm91_vm2, 4, %v220_v37  ;;  %vm183_vm2 = vmand %vm267_vm1, %vm35_vm6 }
  0x84   :  { %v120_v43 = vpop.permute.xlu1 %119  ;;  %v118_v44 = vpop.permute.xlu0 %117  ;;  %v113_v54 = vsel %vm111_vm3, 8, %v220_v37  ;;  %v114_v59 = vsel %vm112_vm5, 8, %v220_v37  ;;  %v95_v62 = vadd.s32 %v93_v52, %v76_v51 }
  0x85   :  { %v123_v46 = vsel %vm121_vm15, %v120_v43, %v118_v44  ;;  %v122_v48 = vsel %vm121_vm15, %v118_v44, %v120_v43  ;;  %v115_v63 = vadd.s32 %v113_v54, %v94_v53 }
  0x86   :  { %v129_v49 = vsel %vm289_vm7, %v123_v46, 0.0  ;;  %vm130_vm9 = vcmp.ge.f32.partialorder %v122_v48, %v234_v0  ;;  %vm161_vm7 = vcmp.lt.s32.totalorder %v257_v3, 1  ;;  %v116_v7 = vadd.s32 %v114_v59, %v95_v62 }
  0x87   :  { %vm131_vm10 = vcmp.ge.f32.partialorder %v129_v49, %v241_v1  ;;  %v132_v2 = vsel %vm130_vm9, 16, %v220_v37 }
  0x88   :  { %v139_v55 = vpop.permute.xlu1 %138  ;;  %v137_v56 = vpop.permute.xlu0 %136  ;;  %v133_v4 = vsel %vm131_vm10, 16, %v220_v37  ;;  %v134_v17 = vadd.s32 %v132_v2, %v115_v63 }
  0x89   :  { %v141_v57 = vsel %vm140_vm4, %v137_v56, %v139_v55  ;;  %v142_v58 = vsel %vm140_vm4, %v139_v55, %v137_v56  ;;  %v135_v18 = vadd.s32 %v133_v4, %v116_v7 }
  0x8a   :  { %v149_v60 = vsel %vm35_vm6, %v141_v57, 0.0  ;;  %v150_v61 = vsel %vm333_vm8, %v142_v58, 0.0 }
  0x8b   :  { %vm151_vm11 = vcmp.ge.f32.partialorder %v149_v60, %v234_v0  ;;  %vm152_vm12 = vcmp.ge.f32.partialorder %v150_v61, %v241_v1 }
  0x8c   :  { %v160_v5 = vpop.permute.xlu1 %159  ;;  %v158_v6 = vpop.permute.xlu0 %157  ;;  %v153_v11 = vsel %vm151_vm11, 32, %v220_v37  ;;  %v154_v14 = vsel %vm152_vm12, 32, %v220_v37 }
  0x8d   :  { %v162_v8 = vsel %vm161_vm7, %v158_v6, %v160_v5  ;;  %v163_v10 = vsel %vm161_vm7, %v160_v5, %v158_v6  ;;  %v155_v23 = vadd.s32 %v153_v11, %v134_v17  ;;  %v156_v24 = vadd.s32 %v154_v14, %v135_v18 }
  0x8e   :  { %v168_v15 = vsel %vm35_vm6, %v163_v10, 0.0  ;;  %v169_v16 = vsel %vm36_vm0, %v162_v8, 0.0 }
  0x8f   :  { %vm170_vm14 = vcmp.ge.f32.partialorder %v168_v15, %v234_v0  ;;  %vm171_vm15 = vcmp.ge.f32.partialorder %v169_v16, %v241_v1 }
  0x90   :  { %v172_v19 = vsel %vm170_vm14, 64, %v220_v37  ;;  %v173_v20 = vsel %vm171_vm15, 64, %v220_v37  ;;  %v179_v21 = vpop.permute.xlu1 %178  ;;  %v177_v22 = vpop.permute.xlu0 %176 }
  0x91   :  { %v181_v25 = vsel %vm180_vm13, %v177_v22, %v179_v21  ;;  %v182_v26 = vsel %vm180_vm13, %v179_v21, %v177_v22  ;;  %v174_v13 = vadd.s32 %v172_v19, %v155_v23  ;;  %v175_v28 = vadd.s32 %v173_v20, %v156_v24 }
  0x92   :  { %v189_v27 = vsel %vm183_vm2, %v182_v26, 0.0  ;;  %v190_v9 = vsel %vm36_vm0, %v181_v25, 0.0 }
  0x93   :  { %vm191_vm1 = vcmp.ge.f32.partialorder %v189_v27, %v234_v0  ;;  %vm192_vm3 = vcmp.ge.f32.partialorder %v190_v9, %v241_v1 }
  0x94   :  { %v193_v29 = vsel %vm191_vm1, 128, %v220_v37  ;;  %v194_v30 = vsel %vm192_vm3, 128, %v220_v37 }
  0x95   :  { %v195_v31 = vadd.s32 %v193_v29, %v174_v13  ;;  %v196_v32 = vadd.s32 %v194_v30, %v175_v28 }
  0x97   :  { %197 = vst [vmem:[%s383_s1] sm:$0xff] %v195_v31  ;;  %198 = vst [vmem:[%s383_s1 + $0x8] sm:$0xff] %v196_v32 }

</bundles_post_ra>
